<compile_context>
chip_gen: v6e
topology: v6e:2x2x1
jax: 0.10.0
libtpu: 0.0.40
codegen_flags: <defaults>
</compile_context>

<pallas_src>
import functools
import math

import jax
import jax.numpy as jnp
from jax.experimental import pallas as pl
from jax.experimental.pallas import tpu as pltpu


def _round_up(a, b):
    return (a + b - 1) // b * b


def _embedding_kernel(ids_ref, table_ref, o_ref, *, scale):
    """One grid step: gather `tn` table rows via a one-hot MXU matmul.

    ids_ref:   VMEM (tn, 1) int32       -- token ids for this tile
    table_ref: VMEM (num_emb, emb_dim)  -- full table, grid-invariant (resident)
    o_ref:     VMEM (tn, emb_dim)       -- output tile, single dense store
    """
    tn = o_ref.shape[0]
    num_emb = table_ref.shape[0]

    ids = ids_ref[...]                                              # (tn, 1)
    iota = jax.lax.broadcasted_iota(jnp.int32, (tn, num_emb), 1)    # (tn, num_emb)
    onehot = (ids == iota).astype(table_ref.dtype)                  # exact 0/1

    # One MXU matmul per tile replaces tn serial scalar-indexed gathers.
    rows = jnp.dot(
        onehot,
        table_ref[...],
        preferred_element_type=jnp.float32,
        precision=jax.lax.Precision.HIGHEST,
    )                                                               # (tn, emb_dim) f32

    # Single tile-wide scale + cast + dense store.
    o_ref[...] = (rows * scale).astype(o_ref.dtype)


def embedding_forward(x_idx, table, *, d_model=None, row_tile=256):
    """Pallas equivalent of `Embedding.forward`: table[x_idx] * sqrt(d_model).

    x_idx: integer array of token ids (any shape), values in [0, table.shape[0]).
    table: (num_embeddings, embedding_dim) -- in the PyTorch module this is
           (d_model, vocab), so d_model defaults to num_embeddings.
    row_tile: tokens processed per grid step (tunable per chip).
    """
    num_emb, emb_dim = table.shape
    if d_model is None:
        d_model = num_emb
    scale = float(math.sqrt(d_model))

    orig_shape = x_idx.shape
    n = int(math.prod(orig_shape))
    flat_idx = x_idx.reshape(n).astype(jnp.int32)

    # Token tile: multiple of 8 sublanes, padded token axis (no asserts).
    row_tile = max(8, _round_up(int(row_tile), 8))
    tn = min(row_tile, _round_up(n, 8))
    n_pad = _round_up(n, tn)
    if n_pad != n:
        flat_idx = jnp.pad(flat_idx, (0, n_pad - n))   # pad ids -> rows discarded below
    ids_col = flat_idx.reshape(n_pad, 1)

    # VMEM budget: resident table + double-buffered id/output tiles (+ slack).
    itemsize = jnp.dtype(table.dtype).itemsize
    table_bytes = num_emb * emb_dim * itemsize
    out_tile_bytes = tn * emb_dim * itemsize
    ids_tile_bytes = tn * 4
    needed = 2 * (table_bytes + out_tile_bytes + ids_tile_bytes) + (4 << 20)
    if needed > (64 << 20):
        # TODO(synk): switch to the HBM-resident table + per-row DMA gather path.
        raise ValueError("embedding table too large for the VMEM-resident path")
    vmem_limit = int(min(max(needed, 16 << 20), 64 << 20))

    out2d = pl.pallas_call(
        functools.partial(_embedding_kernel, scale=scale),
        out_shape=jax.ShapeDtypeStruct((n_pad, emb_dim), table.dtype),
        grid=(n_pad // tn,),
        in_specs=[
            # Token-id column, tiled along the token axis.
            pl.BlockSpec((tn, 1), lambda i: (i, 0)),
            # Full table, grid-invariant: DMA'd into VMEM once, reused each step.
            pl.BlockSpec((num_emb, emb_dim), lambda i: (0, 0)),
        ],
        out_specs=pl.BlockSpec((tn, emb_dim), lambda i: (i, 0)),
        compiler_params=pltpu.CompilerParams(
            dimension_semantics=("parallel",),   # independent token tiles
            vmem_limit_bytes=vmem_limit,
        ),
    )(ids_col, table)

    return out2d[:n].reshape(*orig_shape, emb_dim)


def init_table(key, num_embeddings, embedding_dim, dtype=jnp.float32):
    """Deterministic init mimicking nn.Embedding (standard normal weights)."""
    return jax.random.normal(key, (num_embeddings, embedding_dim), dtype)


if __name__ == "__main__":
    key = jax.random.PRNGKey(0)
    # Module: Embedding(d_model, vocab) -> lut = nn.Embedding(d_model, vocab)
    # (num_embeddings = d_model, embedding_dim = vocab). Keep vocab=128 so the
    # output last dim is lane-dense.
    batch, seq, d_model, vocab = 2, 8, 32, 128

    k_idx, k_tab = jax.random.split(key)
    x_idx = jax.random.randint(k_idx, (batch, seq), 0, d_model, dtype=jnp.int32)
    table = init_table(k_tab, d_model, vocab, jnp.float32)

    out = embedding_forward(x_idx, table, d_model=d_model)
    out = jax.block_until_ready(out)

    # pure-JAX reference
    ref = jnp.take(table, x_idx, axis=0) * math.sqrt(d_model)
    assert out.shape == (batch, seq, vocab)
    assert jnp.allclose(out, ref, atol=1e-5, rtol=1e-5)

    print("KERNEL_OK")
</pallas_src>

<mosaic_0001>
module attributes {stable_mosaic.version = 11 : i64} {
  func.func @_embedding_kernel(%arg0: i32, %arg1: memref<16x1xi32, #tpu.memory_space<vmem>>, %arg2: memref<32x128xf32, #tpu.memory_space<vmem>>, %arg3: memref<16x128xf32, #tpu.memory_space<vmem>>) attributes {dimension_semantics = [#tpu.dimension_semantics<parallel>], iteration_bounds = array<i64: 1>, scalar_prefetch = 0 : i64, scratch_operands = 0 : i64, tpu.core_type = #tpu.core_type<tc>, window_params = [{transform_indices = @transform_0, window_bounds = array<i64: 16, 1>}, {pipeline_mode = #tpu.pipeline_mode<synchronous>, transform_indices = @transform_1, window_bounds = array<i64: 32, 128>}, {transform_indices = @transform_2, window_bounds = array<i64: 16, 128>}]} {
    %c0 = arith.constant 0 : index
    %c0_0 = arith.constant 0 : index
    %0 = vector.load %arg1[%c0, %c0_0] : memref<16x1xi32, #tpu.memory_space<vmem>>, vector<16x1xi32>
    %1 = tpu.iota {dimensions = array<i32: 1>} : vector<16x32xi32>
    %2 = vector.broadcast %0 : vector<16x1xi32> to vector<16x32xi32>
    %3 = arith.cmpi eq, %2, %1 : vector<16x32xi32>
    %4 = arith.extui %3 : vector<16x32xi1> to vector<16x32xi32>
    %5 = arith.sitofp %4 : vector<16x32xi32> to vector<16x32xf32>
    %c0_1 = arith.constant 0 : index
    %c0_2 = arith.constant 0 : index
    %6 = vector.load %arg2[%c0_1, %c0_2] : memref<32x128xf32, #tpu.memory_space<vmem>>, vector<32x128xf32>
    %cst = arith.constant dense<0.000000e+00> : vector<16x128xf32>
    %7 = tpu.matmul %5, %6, %cst {dimension_numbers = #tpu.dot_dimension_numbers<[1], [0], [0], [1], [0, 0, 1, 1], [], []>, precision = #tpu.contract_precision<fp32>} : vector<16x32xf32>, vector<32x128xf32>, vector<16x128xf32> -> vector<16x128xf32>
    %cst_3 = arith.constant 5.65685415 : f32
    %8 = vector.broadcast %cst_3 : f32 to vector<16x128xf32>
    %9 = arith.mulf %7, %8 : vector<16x128xf32>
    %c0_4 = arith.constant 0 : index
    %c0_5 = arith.constant 0 : index
    %10 = vector.load %arg3[%c0_4, %c0_5] : memref<16x128xf32, #tpu.memory_space<vmem>>, vector<16x128xf32>
    tpu.vector_store %arg3[%c0_4, %c0_5], %9 {strides = array<i32>} : memref<16x128xf32, #tpu.memory_space<vmem>>, vector<16x128xf32>,
    return
  }
  func.func @transform_0(%arg0: i32) -> (i32, i32) {
    %c0_i32 = arith.constant 0 : i32
    %c0_i32_0 = arith.constant 0 : i32
    return %arg0, %c0_i32 : i32, i32
  }
  func.func @transform_1(%arg0: i32) -> (i32, i32) {
    %c0_i32 = arith.constant 0 : i32
    %c0_i32_0 = arith.constant 0 : i32
    %c0_i32_1 = arith.constant 0 : i32
    return %c0_i32, %c0_i32_0 : i32, i32
  }
  func.func @transform_2(%arg0: i32) -> (i32, i32) {
    %c0_i32 = arith.constant 0 : i32
    %c0_i32_0 = arith.constant 0 : i32
    return %arg0, %c0_i32 : i32, i32
  }
}

</mosaic_0001>

<bundles_post_ra>
// kernel: tpu_custom_call.1
= control target key start
LH: loop header
LB: loop body
LE: loop exit
PB: predicated region body
PF: predicated region fallthrough
CT: control target
= control target key end

     0   :  { %7 = vsyncpa [#allocation3], 0  ;;  %s890_s0 = inlined_call_operand.vmem [shape: s32[16,1], index: 0, kind: input, shape index: {}]   ;;  %s891_s1 = inlined_call_operand.hbm [shape: f32[32,128], index: 1, kind: input, shape index: {}]   ;;  %s892_s2 = inlined_call_operand.hbm [shape: f32[16,128], index: 2, kind: output, shape index: {}]  }
   0x1   :  { %8 = vsyncpa [#allocation4], 0  ;;  %s763_s9 = smov [#allocation2]  }
   0x2   :  { %s16_s10 = sshll.u32 %s763_s9, 4  ;;  %s17_s10 = int_to_ptr.vmem [resolvable:$true] %s16_s10 }
   0x3   :  { %s727_s11 = scalar_lea.vmem %s17_s10, 512  ;;  %p732_p1 = scmp.lt.s32.totalorder %s17_s10, %s17_s10 }
   0x4   :  { %p728_p0 = scmp.ne.s32.totalorder %s17_s10, %s727_s11  ;;  %p733_p2 = scmp.lt.s32.totalorder %s727_s11, %s727_s11 }
   0x6   :  { %p734_p3 = por %p733_p2, %p732_p1 }
   0x8   :  { %p735_p4 = pnand %p734_p3, %p728_p0 }
   0xa   :  { %738 = shalt.err (!%p735_p4)
}
   0xb   :  { %s764_s12 = smov 128   ;;  %s765_s13 = smov 8  }
   0xc   :  { %22 = dma.hbm_to_vmem [thread:$0]  %s891_s1, 512, %s17_s10, [#allocation3], %s764_s12, %s764_s12, %s765_s13  }
   0xd   :  { %759 = dma.done.wait [#allocation3], 512  }
   0xe   :  { %760 = vsyncadd [#allocation3], 4294966784  ;;  %v766_v0 = vmov 0   ;;  %v26_v1 = vld [vmem:[%s890_s0] sm:$0xff]  ;;  %v45_v2 = vld [vmem:[#allocation2 + $0x18] sm:$0xff]  ;;  %v28_v27 = vlaneseq  ;;  %vm46_vm0 = vcmask 261120  }
   0xf   :  { %718 = vset.pattern.permute.xlu0 %v766_v0  ;;  %v793_v3 = vand.u32 4294901760, %v45_v2  ;;  %v44_v4 = vld [vmem:[#allocation2 + $0x10] sm:$0xff]  ;;  %v43_v5 = vld [vmem:[#allocation2 + $0x8] sm:$0xff]  ;;  %v42_v6 = vld [vmem:[#allocation2] sm:$0xff]  ;;  %v767_v30 = vmov 0.0  }
  0x10   :  { %31 = vperm.xlu0 %718, %v26_v1   ;;  %v27_v7 = vld [vmem:[%s890_s0 + $0x8] sm:$0xff]  ;;  %v798_v8 = vand.u32 4294901760, %v44_v4  ;;  %v800_v9 = vand.u32 4294901760, %v43_v5  ;;  %v802_v10 = vand.u32 4294901760, %v42_v6  ;;  %v29_v28 = vand.u32 127, %v28_v27  ;;  %s768_s0 = smov [#allocation5]  }
  0x11   :  { %v805_v11 = vsub.f32 %v45_v2, %v793_v3  ;;  %646 = vmatprep.subr.mxu0 %v793_v3  ;;  %s590_s1 = sshll.u32 %s768_s0, 4  ;;  %s591_s1 = int_to_ptr.vmem [resolvable:$true] %s590_s1 }
  0x12   :  { %v809_v12 = vsub.f32 %v44_v4, %v798_v8  ;;  %v812_v13 = vsub.f32 %v43_v5, %v800_v9  ;;  %v815_v14 = vsub.f32 %v42_v6, %v802_v10  ;;  %647 = vmatpush3.msra.mxu0 %v793_v3  ;;  %s739_s20 = scalar_lea.vmem %s591_s1, 256  ;;  %p744_p6 = scmp.lt.s32.totalorder %s591_s1, %s591_s1 }
  0x13   :  { %v819_v15 = vand.u32 4294901760, %v805_v11  ;;  %648 = vmatprep.subr.mxu0 %v798_v8  ;;  %p740_p5 = scmp.ne.s32.totalorder %s591_s1, %s739_s20  ;;  %p745_p7 = scmp.lt.s32.totalorder %s739_s20, %s739_s20 }
  0x14   :  { %34 = vperm.xlu0 %718, %v27_v7   ;;  %v823_v16 = vand.u32 4294901760, %v809_v12  ;;  %v826_v17 = vand.u32 4294901760, %v812_v13  ;;  %v829_v18 = vand.u32 4294901760, %v815_v14  ;;  %649 = vmatpush3.msra.mxu0 %v798_v8 }
  0x15   :  { %v170_v19 = vsub.f32 %v805_v11, %v819_v15  ;;  %650 = vmatprep.subr.mxu0 %v800_v9  ;;  %p746_p8 = por %p745_p7, %p744_p6 }
  0x16   :  { %v177_v20 = vsub.f32 %v809_v12, %v823_v16  ;;  %v184_v21 = vsub.f32 %v812_v13, %v826_v17  ;;  %651 = vmatpush3.msra.mxu0 %v800_v9  ;;  %v191_v23 = vsub.f32 %v815_v14, %v829_v18 }
  0x17   :  { %v171_v22 = vand.u32 4294901760, %v170_v19  ;;  %652 = vmatprep.subr.mxu0 %v802_v10  ;;  %p747_p9 = pnand %p746_p8, %p740_p5 }
  0x18   :  { %v178_v24 = vand.u32 4294901760, %v177_v20  ;;  %653 = vmatpush3.msra.mxu0 %v802_v10  ;;  %v185_v25 = vand.u32 4294901760, %v184_v21  ;;  %v192_v26 = vand.u32 4294901760, %v191_v23 }
  0x19   :  { %657 = vmatprep.subr.mxu1 %v171_v22  ;;  %668 = vmatprep.subr.mxu0 %v805_v11 }
  0x1a   :  { %658 = vmatpush3.msra.mxu1 %v171_v22 }
  0x1b   :  { %659 = vmatprep.subr.mxu1 %v178_v24 }
  0x1c   :  { %660 = vmatpush3.msra.mxu1 %v178_v24 }
  0x1d   :  { %661 = vmatprep.subr.mxu1 %v185_v25 }
  0x1e   :  { %662 = vmatpush3.msra.mxu1 %v185_v25 }
  0x1f   :  { %663 = vmatprep.subr.mxu1 %v192_v26 }
  0x20   :  { %664 = vmatpush3.msra.mxu1 %v192_v26 }
  0x21   :  { %679 = vmatprep.subr.mxu1 %v793_v3 }
  0x8b   :  { %v32_v29 = vpop.permute.xlu0 %31 }
  0x8c   :  { %vm36_vm1 = vcmp.eq.s32.totalorder %v32_v29, %v29_v28 }
  0x8d   :  { %v602_v31 = vsel %vm36_vm1, 1.0, %v767_v30 }
  0x8e   :  { %v48_v32 = vsel %vm46_vm0, %v602_v31, 0  ;;  %665 = vmatprep.mubr.msk.f32.mxu1 %vm46_vm0, %v602_v31 }
  0x8f   :  { %v123_v33 = vsub.f32 %v48_v32, %v48_v32  ;;  %v35_v34 = vpop.permute.xlu0 %34 }
  0x90   :  { %vm37_vm2 = vcmp.eq.s32.totalorder %v35_v34, %v29_v28 }
  0x91   :  { %v603_v35 = vsel %vm37_vm2, 1.0, %v767_v30  ;;  %v124_v36 = vand.u32 4294901760, %v123_v33 }
  0x92   :  { %v51_v37 = vsel %vm46_vm0, %v603_v35, 0  ;;  %666 = vmatmul.mubr.msk.f32.vlgmr.msra.gmra.mxu1 %vm46_vm0, %v603_v35 }
  0x93   :  { %v133_v38 = vsub.f32 %v51_v37, %v51_v37  ;;  %680 = vmatpush3.msra.mxu1 %v793_v3  ;;  %687 = vmatprep.mubr.f32.mxu1 %v124_v36  ;;  %v125_v39 = vsub.f32 %v123_v33, %v124_v36 }
  0x94   :  { %681 = vmatprep.subr.mxu1 %v798_v8 }
  0x95   :  { %682 = vmatpush3.msra.mxu1 %v798_v8  ;;  %v126_v40 = vand.u32 4294901760, %v125_v39  ;;  %v134_v41 = vand.u32 4294901760, %v133_v38 }
  0x96   :  { %683 = vmatprep.subr.mxu1 %v800_v9 }
  0x97   :  { %684 = vmatpush3.msra.mxu1 %v800_v9  ;;  %654 = vmatprep.mubr.f32.mxu0 %v126_v40  ;;  %v135_v42 = vsub.f32 %v133_v38, %v134_v41 }
  0x98   :  { %685 = vmatprep.subr.mxu1 %v802_v10 }
  0x99   :  { %686 = vmatpush3.msra.mxu1 %v802_v10  ;;  %v136_v43 = vand.u32 4294901760, %v135_v42 }
  0x9a   :  { %688 = vmatmul.mubr.f32.vlgmr.msra.gmra.mxu1 %v134_v41  ;;  %701 = vmatprep.subr.mxu1 %v793_v3 }
  0x9b   :  { %702 = vmatpush3.msra.mxu1 %v793_v3  ;;  %709 = vmatprep.mubr.msk.f32.mxu1 %vm46_vm0, %v602_v31 }
  0x9c   :  { %655 = vmatmul.mubr.f32.vlgmr.msra.gmra.mxu0 %v136_v43  ;;  %703 = vmatprep.subr.mxu1 %v798_v8 }
  0x9d   :  { %669 = vmatpush3.msra.mxu0 %v805_v11  ;;  %676 = vmatprep.mubr.f32.mxu0 %v123_v33 }
  0x9e   :  { %670 = vmatprep.subr.mxu0 %v809_v12  ;;  %704 = vmatpush3.msra.mxu1 %v798_v8 }
  0x9f   :  { %671 = vmatpush3.msra.mxu0 %v809_v12  ;;  %705 = vmatprep.subr.mxu1 %v800_v9 }
  0xa0   :  { %672 = vmatprep.subr.mxu0 %v812_v13  ;;  %706 = vmatpush3.msra.mxu1 %v800_v9 }
  0xa1   :  { %673 = vmatpush3.msra.mxu0 %v812_v13  ;;  %707 = vmatprep.subr.mxu1 %v802_v10 }
  0xa2   :  { %674 = vmatprep.subr.mxu0 %v815_v14  ;;  %708 = vmatpush3.msra.mxu1 %v802_v10 }
  0xa3   :  { %675 = vmatpush3.msra.mxu0 %v815_v14  ;;  %710 = vmatmul.mubr.msk.f32.vlgmr.msra.gmra.mxu1 %vm46_vm0, %v603_v35 }
  0xa4   :  { %677 = vmatmul.mubr.f32.vlgmr.msra.gmra.mxu0 %v133_v38  ;;  %690 = vmatprep.subr.mxu0 %v819_v15 }
  0xa5   :  { %691 = vmatpush3.msra.mxu0 %v819_v15  ;;  %698 = vmatprep.mubr.msk.f32.mxu0 %vm46_vm0, %v602_v31 }
  0xa6   :  { %692 = vmatprep.subr.mxu0 %v823_v16 }
  0xa7   :  { %693 = vmatpush3.msra.mxu0 %v823_v16 }
  0xa8   :  { %694 = vmatprep.subr.mxu0 %v826_v17 }
  0xa9   :  { %695 = vmatpush3.msra.mxu0 %v826_v17 }
  0xaa   :  { %696 = vmatprep.subr.mxu0 %v829_v18 }
  0xab   :  { %697 = vmatpush3.msra.mxu0 %v829_v18 }
  0xac   :  { %699 = vmatmul.mubr.msk.f32.vlgmr.msra.gmra.mxu0 %vm46_vm0, %v603_v35 }
 0x152   :  { %v667_v45 = vpop.f32.mrf.mxu1 }
 0x154   :  { %v229_v47 = vpop.f32.mrf.mxu1 }
 0x15a   :  { %v689_v50 = vpop.f32.mrf.mxu1 }
 0x15c   :  { %v656_v44 = vpop.f32.mrf.mxu0  ;;  %v399_v55 = vpop.f32.mrf.mxu1 }
 0x15d   :  { %v236_v49 = vadd.f32 %v667_v45, %v656_v44 }
 0x15e   :  { %v128_v46 = vpop.f32.mrf.mxu0 }
 0x15f   :  { %v230_v52 = vadd.f32 %v229_v47, %v128_v46 }
 0x163   :  { %v711_v57 = vpop.f32.mrf.mxu1 }
 0x164   :  { %v678_v48 = vpop.f32.mrf.mxu0 }
 0x165   :  { %v323_v53 = vadd.f32 %v678_v48, %v236_v49  ;;  %v571_v0 = vpop.f32.mrf.mxu1 }
 0x166   :  { %v315_v51 = vpop.f32.mrf.mxu0 }
 0x167   :  { %v316_v54 = vadd.f32 %v315_v51, %v230_v52  ;;  %v408_v56 = vadd.f32 %v689_v50, %v323_v53 }
 0x169   :  { %v400_v60 = vadd.f32 %v399_v55, %v316_v54 }
 0x16c   :  { %v700_v58 = vpop.f32.mrf.mxu0 }
 0x16d   :  { %v497_v59 = vadd.f32 %v700_v58, %v408_v56 }
 0x16e   :  { %v490_v61 = vpop.f32.mrf.mxu0 }
 0x16f   :  { %v578_v62 = vadd.f32 %v711_v57, %v497_v59  ;;  %v491_v63 = vadd.f32 %v490_v61, %v400_v60 }
 0x171   :  { %v582_v1 = vmul.f32 5.656854, %v578_v62  ;;  %v572_v2 = vadd.f32 %v571_v0, %v491_v63 }
 0x173   :  { %584 = vst [vmem:[#allocation5 + $0x8] sm:$0xff] %v582_v1  ;;  %v581_v3 = vmul.f32 5.656854, %v572_v2 }
 0x175   :  { %583 = vst [vmem:[#allocation5] sm:$0xff] %v581_v3 }
 0x176   :  { %750 = shalt.err (!%p747_p9)
}
 0x177   :  { %596 = dma.vmem_to_hbm [thread:$0]  %s591_s1, 256, %s892_s2, [#allocation4], %s764_s12, %s764_s12, %s765_s13  }
 0x178   :  { %761 = dma.done.wait [#allocation4], 256  }
 0x179   :  { %762 = vsyncadd [#allocation4], 4294967040 }
 0x17a   :  { %600 = vsyncpa [#allocation3], 1 }
 0x17b   :  { %601 = vsyncpa [#allocation4], 1 }

</bundles_post_ra>
